<compile_context>
chip_gen: v6e
topology: v6e:2x2x1
jax: 0.10.0
libtpu: 0.0.40
codegen_flags: <defaults>
</compile_context>

<pallas_src>
import jax
import jax.numpy as jnp
from jax.experimental import pallas as pl
from jax.experimental.pallas import tpu as pltpu


def _pair_encoder_kernel(x_ref, w1_ref, b1_ref, w2_ref, b2_ref, w3_ref, b3_ref,
                         o_ref):
    # Feature-major: x_ref is (input_dim, TB), o_ref is (output_dim, TB).
    x = x_ref[...].astype(jnp.float32)

    # Hoist weight / bias reads once per grid step.
    w1 = w1_ref[...]    # (hidden, input_dim)   -- PyTorch (out, in) layout
    b1 = b1_ref[...]    # (hidden, 1)
    w2 = w2_ref[...]    # (hidden, hidden)
    b2 = b2_ref[...]    # (hidden, 1)
    w3 = w3_ref[...]    # (output, hidden)
    b3 = b3_ref[...]    # (output, 1)

    # fc1 on the VPU: K = input_dim (=2); the MXU would be almost entirely
    # idle for such a tiny contraction, so use broadcast mul-adds instead.
    acc = w1[:, 0:1] * x[0:1, :]
    for k in range(1, w1.shape[1]):          # static, tiny (input_dim = 2)
        acc = acc + w1[:, k:k + 1] * x[k:k + 1, :]
    h = jnp.maximum(acc + b1, 0.0)

    # fc2 / fc3 on the MXU, f32 accumulation.
    h = jnp.maximum(jnp.dot(w2, h, preferred_element_type=jnp.float32) + b2, 0.0)
    h = jnp.maximum(jnp.dot(w3, h, preferred_element_type=jnp.float32) + b3, 0.0)

    o_ref[...] = h.astype(o_ref.dtype)


def pack_params(params):
    """One-time packing of PyTorch-convention params into the kernel layout."""
    return {
        "w1": jnp.asarray(params["fc1_w"], jnp.float32),           # (hidden, in)
        "b1": jnp.asarray(params["fc1_b"], jnp.float32)[:, None],  # (hidden, 1)
        "w2": jnp.asarray(params["fc2_w"], jnp.float32),           # (hidden, hidden)
        "b2": jnp.asarray(params["fc2_b"], jnp.float32)[:, None],  # (hidden, 1)
        "w3": jnp.asarray(params["fc3_w"], jnp.float32),           # (out, hidden)
        "b3": jnp.asarray(params["fc3_b"], jnp.float32)[:, None],  # (out, 1)
    }


def pair_encoder_forward(pair, packed, *, batch_tile=1024):
    """pair: (B, input_dim) -> (B, output_dim). `packed` from pack_params()."""
    B = pair.shape[0]
    hid, in_dim = packed["w1"].shape
    out_dim = packed["w3"].shape[0]

    # Batch on the lane axis: tile must be a multiple of 128 lanes.  Keep the
    # per-step VMEM footprint small (fits comfortably in the default scoped
    # VMEM budget on v5e/v6e/v7x even double-buffered).
    b_up = pl.cdiv(B, 128) * 128
    tb = min(batch_tile, b_up)
    b_pad = pl.cdiv(B, tb) * tb
    grid = (b_pad // tb,)

    # Layout plumbing: present the input feature-major and pad the batch.
    x = pair.astype(jnp.float32).T                    # (in_dim, B)
    if b_pad != B:
        x = jnp.pad(x, ((0, 0), (0, b_pad - B)))

    flops = 2 * b_pad * (in_dim * hid + hid * hid + hid * out_dim)
    bytes_accessed = 4 * (b_pad * (in_dim + out_dim)
                          + in_dim * hid + hid * hid + hid * out_dim
                          + 2 * hid + out_dim)

    out_fm = pl.pallas_call(
        _pair_encoder_kernel,
        out_shape=jax.ShapeDtypeStruct((out_dim, b_pad), jnp.float32),
        grid=grid,
        in_specs=[
            # Activations: tiled along batch, pipelined per grid step.
            pl.BlockSpec((in_dim, tb), lambda i: (0, i)),
            # Weights / biases: constant index map -> resident in VMEM.
            pl.BlockSpec((hid, in_dim), lambda i: (0, 0)),
            pl.BlockSpec((hid, 1), lambda i: (0, 0)),
            pl.BlockSpec((hid, hid), lambda i: (0, 0)),
            pl.BlockSpec((hid, 1), lambda i: (0, 0)),
            pl.BlockSpec((out_dim, hid), lambda i: (0, 0)),
            pl.BlockSpec((out_dim, 1), lambda i: (0, 0)),
        ],
        out_specs=pl.BlockSpec((out_dim, tb), lambda i: (0, i)),
        compiler_params=pltpu.CompilerParams(
            dimension_semantics=("parallel",)),
        cost_estimate=pl.CostEstimate(
            flops=flops, transcendentals=0, bytes_accessed=bytes_accessed),
    )(x, packed["w1"], packed["b1"], packed["w2"], packed["b2"],
      packed["w3"], packed["b3"])

    # Back to the module's (B, output_dim) convention; drop batch padding.
    return out_fm[:, :B].T


def init_params(key, input_dim=2, hidden_dim=32, output_dim=64):
    """Deterministic init mimicking nn.Linear default uniform(-1/sqrt(fan_in), +)."""
    ks = jax.random.split(key, 6)

    def lin(kw, kb, fan_in, fan_out):
        bound = 1.0 / jnp.sqrt(fan_in)
        w = jax.random.uniform(kw, (fan_out, fan_in), jnp.float32, -bound, bound)
        b = jax.random.uniform(kb, (fan_out,), jnp.float32, -bound, bound)
        return w, b

    w1, b1 = lin(ks[0], ks[1], input_dim, hidden_dim)
    w2, b2 = lin(ks[2], ks[3], hidden_dim, hidden_dim)
    w3, b3 = lin(ks[4], ks[5], hidden_dim, output_dim)
    return {"fc1_w": w1, "fc1_b": b1,
            "fc2_w": w2, "fc2_b": b2,
            "fc3_w": w3, "fc3_b": b3}


def reference_forward(pair, params):
    """Pure-JAX reference of the PyTorch forward for verification."""
    hp = jax.lax.Precision.HIGHEST
    x = pair.astype(jnp.float32)
    x = jax.nn.relu(jnp.dot(x, params["fc1_w"].T, precision=hp) + params["fc1_b"])
    x = jax.nn.relu(jnp.dot(x, params["fc2_w"].T, precision=hp) + params["fc2_b"])
    x = jax.nn.relu(jnp.dot(x, params["fc3_w"].T, precision=hp) + params["fc3_b"])
    return x


if __name__ == "__main__":
    key = jax.random.PRNGKey(0)
    k_param, k_x = jax.random.split(key)

    B, INPUT_DIM = 8, 2
    params = init_params(k_param, input_dim=INPUT_DIM, hidden_dim=32, output_dim=64)
    packed = pack_params(params)
    pair = jax.random.normal(k_x, (B, INPUT_DIM), jnp.float32)

    out = pair_encoder_forward(pair, packed)
    out = jax.block_until_ready(out)

    ref = reference_forward(pair, params)
    assert out.shape == (B, 64), out.shape
    assert jnp.allclose(out, ref, atol=1e-4, rtol=1e-4), "mismatch vs reference"

    print("KERNEL_OK")
</pallas_src>

<mosaic_0001>
module attributes {stable_mosaic.version = 11 : i64} {
  func.func @_pair_encoder_kernel(%arg0: i32, %arg1: memref<2x128xf32, #tpu.memory_space<vmem>>, %arg2: memref<32x2xf32, #tpu.memory_space<vmem>>, %arg3: memref<32x1xf32, #tpu.memory_space<vmem>>, %arg4: memref<32x32xf32, #tpu.memory_space<vmem>>, %arg5: memref<32x1xf32, #tpu.memory_space<vmem>>, %arg6: memref<64x32xf32, #tpu.memory_space<vmem>>, %arg7: memref<64x1xf32, #tpu.memory_space<vmem>>, %arg8: memref<64x128xf32, #tpu.memory_space<vmem>>) attributes {dimension_semantics = [#tpu.dimension_semantics<parallel>], iteration_bounds = array<i64: 1>, scalar_prefetch = 0 : i64, scratch_operands = 0 : i64, tpu.core_type = #tpu.core_type<tc>, window_params = [{transform_indices = @transform_0, window_bounds = array<i64: 2, 128>}, {pipeline_mode = #tpu.pipeline_mode<synchronous>, transform_indices = @transform_1, window_bounds = array<i64: 32, 2>}, {pipeline_mode = #tpu.pipeline_mode<synchronous>, transform_indices = @transform_2, window_bounds = array<i64: 32, 1>}, {pipeline_mode = #tpu.pipeline_mode<synchronous>, transform_indices = @transform_3, window_bounds = array<i64: 32, 32>}, {pipeline_mode = #tpu.pipeline_mode<synchronous>, transform_indices = @transform_4, window_bounds = array<i64: 32, 1>}, {pipeline_mode = #tpu.pipeline_mode<synchronous>, transform_indices = @transform_5, window_bounds = array<i64: 64, 32>}, {pipeline_mode = #tpu.pipeline_mode<synchronous>, transform_indices = @transform_6, window_bounds = array<i64: 64, 1>}, {transform_indices = @transform_7, window_bounds = array<i64: 64, 128>}]} {
    %c0 = arith.constant 0 : index
    %c0_0 = arith.constant 0 : index
    %0 = vector.load %arg1[%c0, %c0_0] : memref<2x128xf32, #tpu.memory_space<vmem>>, vector<2x128xf32>
    %c0_1 = arith.constant 0 : index
    %c0_2 = arith.constant 0 : index
    %1 = vector.load %arg2[%c0_1, %c0_2] : memref<32x2xf32, #tpu.memory_space<vmem>>, vector<32x2xf32>
    %c0_3 = arith.constant 0 : index
    %c0_4 = arith.constant 0 : index
    %2 = vector.load %arg3[%c0_3, %c0_4] : memref<32x1xf32, #tpu.memory_space<vmem>>, vector<32x1xf32>
    %c0_5 = arith.constant 0 : index
    %c0_6 = arith.constant 0 : index
    %3 = vector.load %arg4[%c0_5, %c0_6] : memref<32x32xf32, #tpu.memory_space<vmem>>, vector<32x32xf32>
    %c0_7 = arith.constant 0 : index
    %c0_8 = arith.constant 0 : index
    %4 = vector.load %arg5[%c0_7, %c0_8] : memref<32x1xf32, #tpu.memory_space<vmem>>, vector<32x1xf32>
    %c0_9 = arith.constant 0 : index
    %c0_10 = arith.constant 0 : index
    %5 = vector.load %arg6[%c0_9, %c0_10] : memref<64x32xf32, #tpu.memory_space<vmem>>, vector<64x32xf32>
    %c0_11 = arith.constant 0 : index
    %c0_12 = arith.constant 0 : index
    %6 = vector.load %arg7[%c0_11, %c0_12] : memref<64x1xf32, #tpu.memory_space<vmem>>, vector<64x1xf32>
    %7 = vector.extract_strided_slice %1 {offsets = [0, 0], sizes = [32, 1], strides = [1, 1]} : vector<32x2xf32> to vector<32x1xf32>
    %8 = vector.extract_strided_slice %0 {offsets = [0, 0], sizes = [1, 128], strides = [1, 1]} : vector<2x128xf32> to vector<1x128xf32>
    %9 = vector.broadcast %7 : vector<32x1xf32> to vector<32x128xf32>
    %10 = vector.broadcast %8 : vector<1x128xf32> to vector<32x128xf32>
    %11 = arith.mulf %9, %10 : vector<32x128xf32>
    %12 = vector.extract_strided_slice %1 {offsets = [0, 1], sizes = [32, 1], strides = [1, 1]} : vector<32x2xf32> to vector<32x1xf32>
    %13 = vector.extract_strided_slice %0 {offsets = [1, 0], sizes = [1, 128], strides = [1, 1]} : vector<2x128xf32> to vector<1x128xf32>
    %14 = vector.broadcast %12 : vector<32x1xf32> to vector<32x128xf32>
    %15 = vector.broadcast %13 : vector<1x128xf32> to vector<32x128xf32>
    %16 = arith.mulf %14, %15 : vector<32x128xf32>
    %17 = arith.addf %11, %16 : vector<32x128xf32>
    %18 = vector.broadcast %2 : vector<32x1xf32> to vector<32x128xf32>
    %19 = arith.addf %17, %18 : vector<32x128xf32>
    %cst = arith.constant 0.000000e+00 : f32
    %20 = vector.broadcast %cst : f32 to vector<32x128xf32>
    %21 = arith.maximumf %19, %20 : vector<32x128xf32>
    %cst_13 = arith.constant dense<0.000000e+00> : vector<32x128xf32>
    %22 = tpu.matmul %3, %21, %cst_13 {dimension_numbers = #tpu.dot_dimension_numbers<[1], [0], [0], [1], [0, 0, 1, 1], [], []>} : vector<32x32xf32>, vector<32x128xf32>, vector<32x128xf32> -> vector<32x128xf32>
    %23 = vector.broadcast %4 : vector<32x1xf32> to vector<32x128xf32>
    %24 = arith.addf %22, %23 : vector<32x128xf32>
    %cst_14 = arith.constant 0.000000e+00 : f32
    %25 = vector.broadcast %cst_14 : f32 to vector<32x128xf32>
    %26 = arith.maximumf %24, %25 : vector<32x128xf32>
    %cst_15 = arith.constant dense<0.000000e+00> : vector<64x128xf32>
    %27 = tpu.matmul %5, %26, %cst_15 {dimension_numbers = #tpu.dot_dimension_numbers<[1], [0], [0], [1], [0, 0, 1, 1], [], []>} : vector<64x32xf32>, vector<32x128xf32>, vector<64x128xf32> -> vector<64x128xf32>
    %28 = vector.broadcast %6 : vector<64x1xf32> to vector<64x128xf32>
    %29 = arith.addf %27, %28 : vector<64x128xf32>
    %cst_16 = arith.constant 0.000000e+00 : f32
    %30 = vector.broadcast %cst_16 : f32 to vector<64x128xf32>
    %31 = arith.maximumf %29, %30 : vector<64x128xf32>
    %c0_17 = arith.constant 0 : index
    %c0_18 = arith.constant 0 : index
    %32 = vector.load %arg8[%c0_17, %c0_18] : memref<64x128xf32, #tpu.memory_space<vmem>>, vector<64x128xf32>
    tpu.vector_store %arg8[%c0_17, %c0_18], %31 {strides = array<i32>} : memref<64x128xf32, #tpu.memory_space<vmem>>, vector<64x128xf32>,
    return
  }
  func.func @transform_0(%arg0: i32) -> (i32, i32) {
    %c0_i32 = arith.constant 0 : i32
    %c0_i32_0 = arith.constant 0 : i32
    return %c0_i32, %arg0 : i32, i32
  }
  func.func @transform_1(%arg0: i32) -> (i32, i32) {
    %c0_i32 = arith.constant 0 : i32
    %c0_i32_0 = arith.constant 0 : i32
    %c0_i32_1 = arith.constant 0 : i32
    return %c0_i32, %c0_i32_0 : i32, i32
  }
  func.func @transform_2(%arg0: i32) -> (i32, i32) {
    %c0_i32 = arith.constant 0 : i32
    %c0_i32_0 = arith.constant 0 : i32
    %c0_i32_1 = arith.constant 0 : i32
    return %c0_i32, %c0_i32_0 : i32, i32
  }
  func.func @transform_3(%arg0: i32) -> (i32, i32) {
    %c0_i32 = arith.constant 0 : i32
    %c0_i32_0 = arith.constant 0 : i32
    %c0_i32_1 = arith.constant 0 : i32
    return %c0_i32, %c0_i32_0 : i32, i32
  }
  func.func @transform_4(%arg0: i32) -> (i32, i32) {
    %c0_i32 = arith.constant 0 : i32
    %c0_i32_0 = arith.constant 0 : i32
    %c0_i32_1 = arith.constant 0 : i32
    return %c0_i32, %c0_i32_0 : i32, i32
  }
  func.func @transform_5(%arg0: i32) -> (i32, i32) {
    %c0_i32 = arith.constant 0 : i32
    %c0_i32_0 = arith.constant 0 : i32
    %c0_i32_1 = arith.constant 0 : i32
    return %c0_i32, %c0_i32_0 : i32, i32
  }
  func.func @transform_6(%arg0: i32) -> (i32, i32) {
    %c0_i32 = arith.constant 0 : i32
    %c0_i32_0 = arith.constant 0 : i32
    %c0_i32_1 = arith.constant 0 : i32
    return %c0_i32, %c0_i32_0 : i32, i32
  }
  func.func @transform_7(%arg0: i32) -> (i32, i32) {
    %c0_i32 = arith.constant 0 : i32
    %c0_i32_0 = arith.constant 0 : i32
    return %c0_i32, %arg0 : i32, i32
  }
}

</mosaic_0001>

<bundles_post_ra>
// kernel: tpu_custom_call.1
= control target key start
LH: loop header
LB: loop body
LE: loop exit
PB: predicated region body
PF: predicated region fallthrough
CT: control target
= control target key end

     0   :  { %v575_v2 = vmov 1   ;;  %v576_v3 = vmov 0   ;;  %s734_s0 = inlined_call_operand.vmem [shape: f32[2,128], index: 0, kind: input, shape index: {}]   ;;  %s735_s1 = inlined_call_operand.vmem [shape: f32[32,2], index: 1, kind: input, shape index: {}]   ;;  %s736_s2 = inlined_call_operand.vmem [shape: f32[32,1], index: 2, kind: input, shape index: {}]   ;;  %s737_s3 = inlined_call_operand.vmem [shape: f32[32,32], index: 3, kind: input, shape index: {}]   ;;  %s738_s4 = inlined_call_operand.vmem [shape: f32[32,1], index: 4, kind: input, shape index: {}]   ;;  %s739_s5 = inlined_call_operand.vmem [shape: f32[64,32], index: 5, kind: input, shape index: {}]   ;;  %s740_s6 = inlined_call_operand.vmem [shape: f32[64,1], index: 6, kind: input, shape index: {}]   ;;  %s741_s7 = inlined_call_operand.hbm [shape: f32[64,128], index: 7, kind: output, shape index: {}]  }
   0x1   :  { %v31_v0 = vld [vmem:[%s735_s1 + $0x18] sm:$0xff]  ;;  %v30_v1 = vld [vmem:[%s735_s1 + $0x10] sm:$0xff]  ;;  %546 = vset.pattern.permute.xlu0 %v575_v2  ;;  %547 = vset.pattern.permute.xlu1 %v576_v3  ;;  %v29_v4 = vld [vmem:[%s735_s1 + $0x8] sm:$0xff] }
   0x2   :  { %101 = vperm.xlu0 %546, %v31_v0   ;;  %72 = vperm.xlu1 %547, %v30_v1  }
   0x6   :  { %548 = vset.pattern.permute.xlu1 %v575_v2  ;;  %93 = vperm.xlu0 %546, %v29_v4  }
   0x7   :  { %97 = vperm.xlu1 %548, %v30_v1  }
   0x8   :  { %12 = vsyncpa [#allocation3], 0  ;;  %v28_v5 = vld [vmem:[%s735_s1] sm:$0xff]  ;;  %v35_v6 = vld [vmem:[%s736_s2 + $0x18] sm:$0xff]  ;;  %vm164_vm0 = vcmask 261120   ;;  %v80_v23 = vlaneseq }
   0x9   :  { %v33_v7 = vld [vmem:[%s736_s2 + $0x8] sm:$0xff]  ;;  %v43_v8 = vld [vmem:[%s738_s4 + $0x18] sm:$0xff]  ;;  %v34_v9 = vld [vmem:[%s736_s2 + $0x10] sm:$0xff] }
   0xa   :  { %550 = vset.pattern.permute.xlu0 %v576_v3  ;;  %v41_v10 = vld [vmem:[%s738_s4 + $0x8] sm:$0xff]  ;;  %v32_v11 = vld [vmem:[%s736_s2] sm:$0xff]  ;;  %v42_v14 = vld [vmem:[%s738_s4 + $0x10] sm:$0xff]  ;;  %v81_v24 = vshrl.u32 %v80_v23, 7 }
   0xb   :  { %549 = vset.pattern.permute.xlu1 %v576_v3  ;;  %77 = vperm.xlu0 %550, %v31_v0   ;;  %v52_v12 = vld [vmem:[%s740_s6] sm:$0xff]  ;;  %v54_v15 = vld [vmem:[%s740_s6 + $0x10] sm:$0xff]  ;;  %v53_v18 = vld [vmem:[%s740_s6 + $0x8] sm:$0xff] }
   0xc   :  { %67 = vperm.xlu1 %549, %v29_v4   ;;  %v36_v13 = vld [vmem:[%s737_s3] sm:$0xff]  ;;  %v58_v19 = vld [vmem:[%s740_s6 + $0x30] sm:$0xff]  ;;  %v55_v20 = vld [vmem:[%s740_s6 + $0x18] sm:$0xff]  ;;  %v106_v27 = vsub.s32 1, %v81_v24  ;;  %v82_v28 = vsub.s32 0, %v81_v24 }
   0xd   :  { %507 = vmatprep.mubr.msk.f32.mxu0 %vm164_vm0, %v36_v13  ;;  %v40_v16 = vld [vmem:[%s738_s4] sm:$0xff]  ;;  %v57_v21 = vld [vmem:[%s740_s6 + $0x28] sm:$0xff]  ;;  %v59_v22 = vld [vmem:[%s740_s6 + $0x38] sm:$0xff] }
   0xe   :  { %v56_v17 = vld [vmem:[%s740_s6 + $0x20] sm:$0xff]  ;;  %v37_v62 = vld [vmem:[%s737_s3 + $0x8] sm:$0xff]  ;;  %v38_v63 = vld [vmem:[%s737_s3 + $0x10] sm:$0xff] }
   0xf   :  { %62 = vperm.xlu0 %550, %v28_v5   ;;  %v27_v30 = vld [vmem:[%s734_s0] sm:$0x3]  ;;  %v39_v0 = vld [vmem:[%s737_s3 + $0x18] sm:$0xff]  ;;  %v50_v23 = vld [vmem:[%s739_s5 + $0x30] sm:$0xff] }
  0x10   :  { %133 = vperm.xlu1 %549, %v35_v6   ;;  %v107_v32 = vrot.slane %v27_v30, %v106_v27  ;;  %v83_v33 = vrot.slane %v27_v30, %v82_v28  ;;  %v44_v1 = vld [vmem:[%s739_s5] sm:$0xff]  ;;  %v51_v24 = vld [vmem:[%s739_s5 + $0x38] sm:$0xff] }
  0x13   :  { %123 = vperm.xlu0 %550, %v33_v7  }
  0x14   :  { %551 = vset.pattern.permute.xlu1 %v575_v2  ;;  %v46_v2 = vld [vmem:[%s739_s5 + $0x10] sm:$0xff] }
  0x15   :  { %89 = vperm.xlu1 %551, %v28_v5   ;;  %524 = vmatprep.mubr.msk.f32.mxu1 %vm164_vm0, %v46_v2 }
  0x17   :  { %161 = vperm.xlu0 %550, %v43_v8  }
  0x19   :  { %552 = vset.pattern.permute.xlu1 %v576_v3 }
  0x1a   :  { %128 = vperm.xlu1 %552, %v34_v9  }
  0x1b   :  { %151 = vperm.xlu0 %550, %v41_v10  }
  0x1e   :  { %118 = vperm.xlu1 %552, %v32_v11  }
  0x1f   :  { %268 = vperm.xlu0 %550, %v52_v12  }
  0x22   :  { %156 = vperm.xlu1 %552, %v42_v14  }
  0x23   :  { %278 = vperm.xlu0 %550, %v54_v15  }
  0x26   :  { %146 = vperm.xlu1 %552, %v40_v16  }
  0x27   :  { %288 = vperm.xlu0 %550, %v56_v17  }
  0x2a   :  { %273 = vperm.xlu1 %552, %v53_v18  }
  0x2b   :  { %298 = vperm.xlu0 %550, %v58_v19   ;;  %v45_v19 = vld [vmem:[%s739_s5 + $0x8] sm:$0xff] }
  0x2e   :  { %283 = vperm.xlu1 %552, %v55_v20   ;;  %v47_v20 = vld [vmem:[%s739_s5 + $0x18] sm:$0xff] }
  0x32   :  { %293 = vperm.xlu1 %552, %v57_v21   ;;  %v48_v21 = vld [vmem:[%s739_s5 + $0x20] sm:$0xff] }
  0x36   :  { %303 = vperm.xlu1 %552, %v59_v22   ;;  %v49_v22 = vld [vmem:[%s739_s5 + $0x28] sm:$0xff]  ;;  %s577_s5 = smov [#allocation2]  }
  0x37   :  { %s456_s13 = sshll.u32 %s577_s5, 4  ;;  %s457_s13 = int_to_ptr.vmem [resolvable:$true] %s456_s13 }
  0x38   :  { %s553_s4 = scalar_lea.vmem %s457_s13, 1024  ;;  %p558_p1 = scmp.lt.s32.totalorder %s457_s13, %s457_s13 }
  0x39   :  { %p554_p0 = scmp.ne.s32.totalorder %s457_s13, %s553_s4  ;;  %p559_p2 = scmp.lt.s32.totalorder %s553_s4, %s553_s4 }
  0x3b   :  { %p560_p3 = por %p559_p2, %p558_p1 }
  0x3d   :  { %p561_p4 = pnand %p560_p3, %p554_p0 }
  0x7d   :  { %v73_v25 = vpop.permute.xlu1 %72  ;;  %v102_v26 = vpop.permute.xlu0 %101 }
  0x7e   :  { %v111_v34 = vmul.f32 %v107_v32, %v102_v26  ;;  %v86_v47 = vmul.f32 %v83_v33, %v73_v25 }
  0x81   :  { %v94_v29 = vpop.permute.xlu0 %93 }
  0x82   :  { %v98_v31 = vpop.permute.xlu1 %97  ;;  %v109_v44 = vmul.f32 %v107_v32, %v94_v29 }
  0x83   :  { %v110_v43 = vmul.f32 %v107_v32, %v98_v31 }
  0x85   :  { %v114_v52 = vadd.f32 %v110_v43, %v86_v47 }
  0x86   :  { %v78_v35 = vpop.permute.xlu0 %77 }
  0x87   :  { %v87_v36 = vmul.f32 %v83_v33, %v78_v35  ;;  %v68_v37 = vpop.permute.xlu1 %67 }
  0x88   :  { %v85_v45 = vmul.f32 %v83_v33, %v68_v37 }
  0x89   :  { %v115_v38 = vadd.f32 %v111_v34, %v87_v36 }
  0x8a   :  { %v63_v41 = vpop.permute.xlu0 %62  ;;  %v113_v50 = vadd.f32 %v109_v44, %v85_v45 }
  0x8b   :  { %v134_v39 = vpop.permute.xlu1 %133  ;;  %v84_v49 = vmul.f32 %v83_v33, %v63_v41 }
  0x8c   :  { %v139_v40 = vadd.f32 %v134_v39, %v115_v38 }
  0x8e   :  { %v143_v42 = vmax.f32 %v139_v40, 0.0  ;;  %v124_v48 = vpop.permute.xlu0 %123 }
  0x8f   :  { %v137_v54 = vadd.f32 %v124_v48, %v113_v50 }
  0x90   :  { %v90_v46 = vpop.permute.xlu1 %89  ;;  %499 = vmatprep.subr.mxu0 %v143_v42 }
  0x91   :  { %500 = vmatpush3.msra.mxu0 %v143_v42  ;;  %v108_v51 = vmul.f32 %v107_v32, %v90_v46  ;;  %v141_v59 = vmax.f32 %v137_v54, 0.0 }
  0x92   :  { %v162_v3 = vpop.permute.xlu0 %161 }
  0x93   :  { %v112_v57 = vadd.f32 %v108_v51, %v84_v49 }
  0x95   :  { %v129_v53 = vpop.permute.xlu1 %128 }
  0x96   :  { %v138_v55 = vadd.f32 %v129_v53, %v114_v52  ;;  %v152_v9 = vpop.permute.xlu0 %151 }
  0x98   :  { %v142_v56 = vmax.f32 %v138_v55, 0.0 }
  0x99   :  { %v119_v58 = vpop.permute.xlu1 %118 }
  0x9a   :  { %v136_v60 = vadd.f32 %v119_v58, %v112_v57  ;;  %501 = vmatprep.subr.mxu0 %v142_v56  ;;  %v269_v26 = vpop.permute.xlu0 %268 }
  0x9b   :  { %502 = vmatpush3.msra.mxu0 %v142_v56 }
  0x9c   :  { %v140_v61 = vmax.f32 %v136_v60, 0.0  ;;  %503 = vmatprep.subr.mxu0 %v141_v59 }
  0x9d   :  { %504 = vmatpush3.msra.mxu0 %v141_v59  ;;  %v157_v5 = vpop.permute.xlu1 %156 }
  0x9e   :  { %505 = vmatprep.subr.mxu0 %v140_v61  ;;  %v279_v28 = vpop.permute.xlu0 %278 }
  0x9f   :  { %506 = vmatpush3.msra.mxu0 %v140_v61 }
  0xa0   :  { %508 = vmatmul.mubr.msk.f32.vlgmr.msra.gmra.mxu0 %vm164_vm0, %v37_v62 }
  0xa1   :  { %510 = vmatprep.mubr.msk.f32.mxu0 %vm164_vm0, %v38_v63  ;;  %v147_v14 = vpop.permute.xlu1 %146 }
  0xa2   :  { %v289_v40 = vpop.permute.xlu0 %288 }
  0xa4   :  { %511 = vmatmul.mubr.msk.f32.gmra.mxu0 %vm164_vm0, %v39_v0 }
  0xa5   :  { %521 = vmatprep.mubr.msk.f32.mxu0 %vm164_vm0, %v44_v1  ;;  %v274_v25 = vpop.permute.xlu1 %273 }
  0xa6   :  { %v299_v52 = vpop.permute.xlu0 %298 }
  0xa9   :  { %v284_v27 = vpop.permute.xlu1 %283 }
  0xad   :  { %v294_v31 = vpop.permute.xlu1 %293 }
  0xb1   :  { %v304_v48 = vpop.permute.xlu1 %303 }
 0x160   :  { %v509_v4 = vpop.f32.mrf.mxu0 }
 0x161   :  { %v249_v11 = vadd.f32 %v509_v4, %v152_v9 }
 0x162   :  { %v243_v6 = vpop.f32.mrf.mxu0 }
 0x163   :  { %v244_v15 = vadd.f32 %v243_v6, %v147_v14  ;;  %v263_v17 = vmax.f32 %v249_v11, 0.0 }
 0x164   :  { %v512_v7 = vpop.f32.mrf.mxu0 }
 0x165   :  { %v259_v8 = vadd.f32 %v512_v7, %v162_v3  ;;  %v262_v18 = vmax.f32 %v244_v15, 0.0 }
 0x166   :  { %v253_v10 = vpop.f32.mrf.mxu0 }
 0x167   :  { %v265_v12 = vmax.f32 %v259_v8, 0.0  ;;  %v254_v13 = vadd.f32 %v253_v10, %v157_v5 }
 0x169   :  { %v264_v16 = vmax.f32 %v254_v13, 0.0  ;;  %513 = vmatprep.subr.mxu0 %v265_v12  ;;  %533 = vmatprep.subr.mxu1 %v265_v12 }
 0x16a   :  { %514 = vmatpush3.msra.mxu0 %v265_v12  ;;  %537 = vmatpush3.msra.mxu1 %v265_v12 }
 0x16b   :  { %515 = vmatprep.subr.mxu0 %v264_v16  ;;  %534 = vmatprep.subr.mxu1 %v264_v16 }
 0x16c   :  { %516 = vmatpush3.msra.mxu0 %v264_v16  ;;  %538 = vmatpush3.msra.mxu1 %v264_v16 }
 0x16d   :  { %517 = vmatprep.subr.mxu0 %v263_v17  ;;  %535 = vmatprep.subr.mxu1 %v263_v17 }
 0x16e   :  { %518 = vmatpush3.msra.mxu0 %v263_v17  ;;  %539 = vmatpush3.msra.mxu1 %v263_v17 }
 0x16f   :  { %519 = vmatprep.subr.mxu0 %v262_v18  ;;  %536 = vmatprep.subr.mxu1 %v262_v18 }
 0x170   :  { %520 = vmatpush3.msra.mxu0 %v262_v18  ;;  %540 = vmatpush3.msra.mxu1 %v262_v18 }
 0x171   :  { %522 = vmatmul.mubr.msk.f32.vlgmr.msra.gmra.mxu0 %vm164_vm0, %v45_v19  ;;  %525 = vmatmul.mubr.msk.f32.vlgmr.msra.gmra.mxu1 %vm164_vm0, %v47_v20 }
 0x172   :  { %527 = vmatprep.mubr.msk.f32.mxu1 %vm164_vm0, %v48_v21 }
 0x175   :  { %528 = vmatmul.mubr.msk.f32.gmra.mxu1 %vm164_vm0, %v49_v22 }
 0x176   :  { %530 = vmatprep.mubr.msk.f32.mxu1 %vm164_vm0, %v50_v23 }
 0x179   :  { %531 = vmatmul.mubr.msk.f32.gmra.mxu1 %vm164_vm0, %v51_v24 }
 0x231   :  { %v523_v29 = vpop.f32.mrf.mxu0  ;;  %v526_v30 = vpop.f32.mrf.mxu1 }
 0x232   :  { %v402_v32 = vadd.f32 %v523_v29, %v274_v25  ;;  %v412_v33 = vadd.f32 %v526_v30, %v284_v27 }
 0x233   :  { %v396_v34 = vpop.f32.mrf.mxu0  ;;  %v406_v35 = vpop.f32.mrf.mxu1 }
 0x234   :  { %v436_v36 = vmax.f32 %v402_v32, 0.0  ;;  %v438_v37 = vmax.f32 %v412_v33, 0.0  ;;  %v397_v38 = vadd.f32 %v396_v34, %v269_v26  ;;  %v407_v39 = vadd.f32 %v406_v35, %v279_v28 }
 0x235   :  { %v529_v41 = vpop.f32.mrf.mxu1 }
 0x236   :  { %444 = vst [vmem:[#allocation2 + $0x8] sm:$0xff] %v436_v36  ;;  %446 = vst [vmem:[#allocation2 + $0x18] sm:$0xff] %v438_v37  ;;  %v435_v42 = vmax.f32 %v397_v38, 0.0  ;;  %v437_v43 = vmax.f32 %v407_v39, 0.0  ;;  %v422_v44 = vadd.f32 %v529_v41, %v294_v31 }
 0x237   :  { %v416_v45 = vpop.f32.mrf.mxu1 }
 0x238   :  { %443 = vst [vmem:[#allocation2] sm:$0xff] %v435_v42  ;;  %445 = vst [vmem:[#allocation2 + $0x10] sm:$0xff] %v437_v43  ;;  %v440_v46 = vmax.f32 %v422_v44, 0.0  ;;  %v417_v47 = vadd.f32 %v416_v45, %v289_v40 }
 0x239   :  { %v532_v49 = vpop.f32.mrf.mxu1 }
 0x23a   :  { %448 = vst [vmem:[#allocation2 + $0x28] sm:$0xff] %v440_v46  ;;  %v439_v50 = vmax.f32 %v417_v47, 0.0  ;;  %v432_v51 = vadd.f32 %v532_v49, %v304_v48 }
 0x23b   :  { %v426_v53 = vpop.f32.mrf.mxu1 }
 0x23c   :  { %447 = vst [vmem:[#allocation2 + $0x20] sm:$0xff] %v439_v50  ;;  %v442_v54 = vmax.f32 %v432_v51, 0.0  ;;  %v427_v55 = vadd.f32 %v426_v53, %v299_v52 }
 0x23e   :  { %450 = vst [vmem:[#allocation2 + $0x38] sm:$0xff] %v442_v54  ;;  %v441_v56 = vmax.f32 %v427_v55, 0.0 }
 0x240   :  { %449 = vst [vmem:[#allocation2 + $0x30] sm:$0xff] %v441_v56 }
 0x241   :  { %564 = shalt.err (!%p561_p4)
}
 0x242   :  { %s578_s14 = smov 128   ;;  %s579_s15 = smov 8  }
 0x243   :  { %462 = dma.vmem_to_hbm [thread:$0]  %s457_s13, 1024, %s741_s7, [#allocation3], %s578_s14, %s578_s14, %s579_s15  }
 0x244   :  { %573 = dma.done.wait [#allocation3], 1024  }
 0x245   :  { %574 = vsyncadd [#allocation3], 4294966272 }
 0x246   :  { %466 = vsyncpa [#allocation3], 1 }

</bundles_post_ra>
